<compile_context>
chip_gen: v7x
topology: tpu7x:2x2x1
jax: 0.10.0
libtpu: 0.0.40
codegen_flags: <defaults>
</compile_context>

<pallas_src>
import functools

import jax
import jax.numpy as jnp
from jax import lax
from jax.experimental import pallas as pl
from jax.experimental.pallas import tpu as pltpu


def _twin_mse_kernel(h1_ref, h2_ref, p_ref, *, batch_size, d_total, tile_d,
                     ragged):
    """One feature tile: per-column centered moments of both halves, then the
    closed-form per-column sum of squared standardized differences."""
    h1 = h1_ref[0].astype(jnp.float32)            # (B, TD)
    h2 = h2_ref[0].astype(jnp.float32)            # (B, TD)
    B = batch_size

    inv_n = jnp.float32(1.0 / B)
    m1 = jnp.sum(h1, axis=0, keepdims=True) * inv_n
    m2 = jnp.sum(h2, axis=0, keepdims=True) * inv_n
    d1 = h1 - m1
    d2 = h2 - m2

    ss1 = jnp.sum(d1 * d1, axis=0, keepdims=True)   # (1, TD)
    ss2 = jnp.sum(d2 * d2, axis=0, keepdims=True)
    s12 = jnp.sum(d1 * d2, axis=0, keepdims=True)

    # sum_b ((d1/s1) - (d2/s2))^2 = 2*(B-1)*(1 - s12/sqrt(ss1*ss2)),
    # with s^2 = ss/(B-1) (torch's unbiased std).  One EUP rsqrt per column.
    corr = s12 * lax.rsqrt(ss1 * ss2)
    partial = jnp.float32(2.0 * (B - 1)) * (jnp.float32(1.0) - corr)

    if ragged:
        # Last tile may extend past D; zero the out-of-range lanes (their
        # padded input would otherwise produce NaN via 0 * inf).
        j = pl.program_id(0)
        col = j * tile_d + lax.broadcasted_iota(jnp.int32, partial.shape, 1)
        partial = jnp.where(col < d_total, partial, jnp.float32(0.0))

    p_ref[...] = partial


def _vmem_capacity_bytes():
    try:
        cap = int(pltpu.get_tpu_info().vmem_capacity_bytes)
        return min(cap, 128 << 20)           # clamp to a sane per-TC value
    except Exception:
        return 64 << 20                      # conservative (v7x per-TC) fallback


def _pick_tile_d(batch_size, d, in_bytes):
    """Feature-tile width: ~2 MiB/step input slab, a multiple of 128 lanes,
    at least min(4, D//128) grid steps (pipeline overlap + v7x megacore), and
    an HONEST f32 working-set estimate that fits a VMEM budget."""
    if d <= 128:
        return d
    vmem_cap = _vmem_capacity_bytes()
    budget = int(vmem_cap * 0.4)
    # Per lane-column cost: double-buffered input slabs for BOTH halves plus
    # ~4 full-size f32 intermediates the kernel materializes (upcast/centered
    # copies and products) — not just the raw input bytes.
    per_lane_ws = 2 * 2 * batch_size * in_bytes + 4 * batch_size * 4
    per_lane_in = 2 * batch_size * in_bytes
    target_slab = 2 << 20                    # ~2 MiB of input per grid step
    t = min(target_slab // per_lane_in, budget // per_lane_ws)
    t = max(128, (t // 128) * 128)
    t = min(t, (d // 128) * 128)             # never exceed D
    # Never collapse to a single giant tile: keep several grid steps so DMA
    # and compute overlap and one v7x TensorCore is not left idle.
    min_tiles = min(4, d // 128)
    while t > 128 and pl.cdiv(d, t) < min_tiles:
        t -= 128
    return t


def twin_mse_loss(output, batch_size, *, reduction="mean", tile_d=None):
    """Pallas implementation of TwinMSELoss.forward.

    output: (2*batch_size, D), float32 or bfloat16.
    """
    assert output.ndim == 2, "layout: (2*B, D)"
    two_b, d = output.shape
    assert two_b == 2 * batch_size
    assert reduction in ("mean", "sum")

    B = batch_size
    in_bytes = jnp.dtype(output.dtype).itemsize
    if tile_d is None:
        tile_d = _pick_tile_d(B, d, in_bytes)
    else:
        tile_d = max(1, min(int(tile_d), d))

    ragged = (d % tile_d) != 0
    num_tiles = pl.cdiv(d, tile_d)

    # Free leading-axis view: the BlockSpecs below select the halves directly,
    # so the kernel never loads + slices a combined (2B, tile_d) block.
    x3 = output.reshape(2, B, d)

    # Honest VMEM limit: double-buffered input slabs for both halves + the f32
    # intermediates + output blocks, with margin, capped at per-TC capacity.
    needed = (2 * 2 * B * tile_d * in_bytes      # 2 halves, double-buffered
              + 4 * B * tile_d * 4               # f32 intermediates
              + 2 * tile_d * 4)                  # double-buffered output block
    vmem_cap = _vmem_capacity_bytes()
    vmem_limit = min(vmem_cap, max(32 << 20, needed + (4 << 20)))

    kernel = functools.partial(
        _twin_mse_kernel,
        batch_size=B,
        d_total=d,
        tile_d=tile_d,
        ragged=ragged,
    )

    partials = pl.pallas_call(
        kernel,
        out_shape=jax.ShapeDtypeStruct((1, d), jnp.float32),
        grid_spec=pltpu.PrefetchScalarGridSpec(
            num_scalar_prefetch=0,
            grid=(num_tiles,),
            in_specs=[
                pl.BlockSpec((1, B, tile_d), lambda j: (0, 0, j)),   # h1 tile
                pl.BlockSpec((1, B, tile_d), lambda j: (1, 0, j)),   # h2 tile
            ],
            out_specs=pl.BlockSpec((1, tile_d), lambda j: (0, j)),
        ),
        compiler_params=pltpu.CompilerParams(
            dimension_semantics=("parallel",),   # independent tiles -> megacore
            vmem_limit_bytes=vmem_limit,
        ),
    )(x3, x3)

    total = jnp.sum(partials)
    if reduction == "mean":
        total = total / jnp.float32(B * d)
    return total


def _twin_mse_loss_ref(output, batch_size):
    h1 = output[:batch_size].astype(jnp.float32)
    h2 = output[batch_size:].astype(jnp.float32)
    h1 = (h1 - h1.mean(0, keepdims=True)) / h1.std(0, keepdims=True, ddof=1)
    h2 = (h2 - h2.mean(0, keepdims=True)) / h2.std(0, keepdims=True, ddof=1)
    return jnp.mean((h1 - h2) ** 2)


if __name__ == "__main__":
    batch_size = 8
    D = 512                                   # small feature dim for the test
    key = jax.random.PRNGKey(0)
    x = jax.random.normal(key, (2 * batch_size, D), dtype=jnp.float32)

    # f32, auto tile (4 tiles of 128 lanes).
    loss = jax.block_until_ready(twin_mse_loss(x, batch_size))
    ref = jax.block_until_ready(_twin_mse_loss_ref(x, batch_size))
    assert jnp.allclose(loss, ref, rtol=1e-5, atol=1e-5), (loss, ref)

    # bf16 input path (halves HBM traffic; math still f32 in-kernel).
    xb = x.astype(jnp.bfloat16)
    loss_b = jax.block_until_ready(twin_mse_loss(xb, batch_size))
    ref_b = jax.block_until_ready(
        _twin_mse_loss_ref(xb.astype(jnp.float32), batch_size))
    assert jnp.allclose(loss_b, ref_b, rtol=1e-4, atol=1e-4), (loss_b, ref_b)

    # Explicit tile with ragged last feature tile (512 = 384 + 128 ragged).
    loss_t = jax.block_until_ready(twin_mse_loss(x, batch_size, tile_d=384))
    assert jnp.allclose(loss_t, ref, rtol=1e-5, atol=1e-5), (loss_t, ref)

    # Non-multiple-of-8 batch and non-multiple-of-128 feature dim (ragged auto).
    x2 = jax.random.normal(jax.random.PRNGKey(1), (2 * 12, 260),
                           dtype=jnp.float32)
    loss_r = jax.block_until_ready(twin_mse_loss(x2, 12))
    ref_r = jax.block_until_ready(_twin_mse_loss_ref(x2, 12))
    assert jnp.allclose(loss_r, ref_r, rtol=1e-5, atol=1e-5), (loss_r, ref_r)

    # reduction='sum' sanity check.
    loss_s = jax.block_until_ready(
        twin_mse_loss(x, batch_size, reduction="sum"))
    assert jnp.allclose(loss_s, ref * (batch_size * D), rtol=1e-5, atol=1e-4), (
        loss_s, ref * (batch_size * D))

    print("KERNEL_OK")
</pallas_src>

<mosaic_0001>
module attributes {stable_mosaic.version = 11 : i64} {
  func.func @_twin_mse_kernel(%arg0: i32, %arg1: memref<1x8x128xf32, #tpu.memory_space<vmem>>, %arg2: memref<1x8x128xf32, #tpu.memory_space<vmem>>, %arg3: memref<1x128xf32, #tpu.memory_space<vmem>>) attributes {dimension_semantics = [#tpu.dimension_semantics<parallel>], iteration_bounds = array<i64: 4>, scalar_prefetch = 0 : i64, scratch_operands = 0 : i64, tpu.core_type = #tpu.core_type<tc>, window_params = [{transform_indices = @transform_0, window_bounds = array<i64: 1, 8, 128>}, {transform_indices = @transform_1, window_bounds = array<i64: 1, 8, 128>}, {transform_indices = @transform_2, window_bounds = array<i64: 1, 128>}]} {
    %c0 = arith.constant 0 : index
    %c0_0 = arith.constant 0 : index
    %c0_1 = arith.constant 0 : index
    %0 = vector.load %arg1[%c0, %c0_0, %c0_1] : memref<1x8x128xf32, #tpu.memory_space<vmem>>, vector<1x8x128xf32>
    %1 = vector.shape_cast %0 : vector<1x8x128xf32> to vector<8x128xf32>
    %c0_2 = arith.constant 0 : index
    %c0_3 = arith.constant 0 : index
    %c0_4 = arith.constant 0 : index
    %2 = vector.load %arg2[%c0_2, %c0_3, %c0_4] : memref<1x8x128xf32, #tpu.memory_space<vmem>>, vector<1x8x128xf32>
    %3 = vector.shape_cast %2 : vector<1x8x128xf32> to vector<8x128xf32>
    %cst = arith.constant dense<0.000000e+00> : vector<128xf32>
    %4 = vector.multi_reduction <add>, %1, %cst [0] : vector<8x128xf32> to vector<128xf32>
    %5 = vector.shape_cast %4 : vector<128xf32> to vector<1x128xf32>
    %cst_5 = arith.constant 1.250000e-01 : f32
    %6 = vector.broadcast %cst_5 : f32 to vector<1x128xf32>
    %7 = arith.mulf %5, %6 : vector<1x128xf32>
    %cst_6 = arith.constant dense<0.000000e+00> : vector<128xf32>
    %8 = vector.multi_reduction <add>, %3, %cst_6 [0] : vector<8x128xf32> to vector<128xf32>
    %9 = vector.shape_cast %8 : vector<128xf32> to vector<1x128xf32>
    %cst_7 = arith.constant 1.250000e-01 : f32
    %10 = vector.broadcast %cst_7 : f32 to vector<1x128xf32>
    %11 = arith.mulf %9, %10 : vector<1x128xf32>
    %12 = vector.broadcast %7 : vector<1x128xf32> to vector<8x128xf32>
    %13 = arith.subf %1, %12 : vector<8x128xf32>
    %14 = vector.broadcast %11 : vector<1x128xf32> to vector<8x128xf32>
    %15 = arith.subf %3, %14 : vector<8x128xf32>
    %16 = arith.mulf %13, %13 : vector<8x128xf32>
    %cst_8 = arith.constant dense<0.000000e+00> : vector<128xf32>
    %17 = vector.multi_reduction <add>, %16, %cst_8 [0] : vector<8x128xf32> to vector<128xf32>
    %18 = vector.shape_cast %17 : vector<128xf32> to vector<1x128xf32>
    %19 = arith.mulf %15, %15 : vector<8x128xf32>
    %cst_9 = arith.constant dense<0.000000e+00> : vector<128xf32>
    %20 = vector.multi_reduction <add>, %19, %cst_9 [0] : vector<8x128xf32> to vector<128xf32>
    %21 = vector.shape_cast %20 : vector<128xf32> to vector<1x128xf32>
    %22 = arith.mulf %13, %15 : vector<8x128xf32>
    %cst_10 = arith.constant dense<0.000000e+00> : vector<128xf32>
    %23 = vector.multi_reduction <add>, %22, %cst_10 [0] : vector<8x128xf32> to vector<128xf32>
    %24 = vector.shape_cast %23 : vector<128xf32> to vector<1x128xf32>
    %25 = arith.mulf %18, %21 : vector<1x128xf32>
    %26 = math.rsqrt %25 : vector<1x128xf32>
    %27 = arith.mulf %24, %26 : vector<1x128xf32>
    %cst_11 = arith.constant 1.000000e+00 : f32
    %28 = vector.broadcast %cst_11 : f32 to vector<1x128xf32>
    %29 = arith.subf %28, %27 : vector<1x128xf32>
    %cst_12 = arith.constant 1.400000e+01 : f32
    %30 = vector.broadcast %cst_12 : f32 to vector<1x128xf32>
    %31 = arith.mulf %30, %29 : vector<1x128xf32>
    %c0_13 = arith.constant 0 : index
    %c0_14 = arith.constant 0 : index
    %32 = vector.load %arg3[%c0_13, %c0_14] : memref<1x128xf32, #tpu.memory_space<vmem>>, vector<1x128xf32>
    tpu.vector_store %arg3[%c0_13, %c0_14], %31 {strides = array<i32>} : memref<1x128xf32, #tpu.memory_space<vmem>>, vector<1x128xf32>,
    return
  }
  func.func @transform_0(%arg0: i32) -> (i32, i32, i32) {
    %c0_i32 = arith.constant 0 : i32
    %c0_i32_0 = arith.constant 0 : i32
    %c0_i32_1 = arith.constant 0 : i32
    return %c0_i32, %c0_i32_0, %arg0 : i32, i32, i32
  }
  func.func @transform_1(%arg0: i32) -> (i32, i32, i32) {
    %c1_i32 = arith.constant 1 : i32
    %c0_i32 = arith.constant 0 : i32
    %c0_i32_0 = arith.constant 0 : i32
    return %c1_i32, %c0_i32, %arg0 : i32, i32, i32
  }
  func.func @transform_2(%arg0: i32) -> (i32, i32) {
    %c0_i32 = arith.constant 0 : i32
    %c0_i32_0 = arith.constant 0 : i32
    return %c0_i32, %arg0 : i32, i32
  }
}

</mosaic_0001>

<bundles_post_ra>
// kernel: tpu_custom_call.1
= control target key start
LH: loop header
LB: loop body
LE: loop exit
PB: predicated region body
PF: predicated region fallthrough
CT: control target
= control target key end

     0   :  { %7 = vsyncpa [#allocation3], 0  ;;  %s768_s0 = inlined_call_operand.hbm [shape: f32[2,8,512], index: 0, kind: input, shape index: {}]   ;;  %s769_s1 = inlined_call_operand.hbm [shape: f32[2,8,512], index: 1, kind: input, shape index: {}]   ;;  %s770_s2 = inlined_call_operand.hbm [shape: f32[1,512], index: 2, kind: output, shape index: {}]  }
   0x1   :  { %9 = vsyncpa [#allocation3 + $0x1], 0 }
   0x2   :  { %10 = vsyncpa [#allocation6], 0 }
   0x3   :  { %12 = vsyncpa [#allocation6 + $0x1], 0 }
   0x4   :  { %13 = vsyncpa [#allocation4], 0 }
   0x5   :  { %15 = vsyncpa [#allocation4 + $0x1], 0  ;;  %s561_s9 = smov 0   ;;  %s563_s10 = smov 0  }
   0x6   :  { %s565_s11 = smov 0   ;;  %s567_s12 = smov 0  }
   0x7 LB: > { %s582_s13 = sadd.s32 4294967295, %s541_s12   ;;  %s344_s14 = sadd.s32 4294967294, %s541_s12   ;;  %s541_s12 = sphi %s567_s12, %s788_s12   ;;  %s537_s11 = sphi %s565_s11, %s787_s11   ;;  %s533_s10 = sphi %s563_s10, %s786_s10   ;;  %s529_s9 = sphi %s561_s9, %s785_s9  }
   0x8   : > { %s586_s15 = sadd.s32 1, %s541_s12   ;;  %s28_s16 = sadd.s32 1, %s537_s11 }
   0x9   : > { %s25_s17 = ssub.s32 %s541_s12, %s586_s15  ;;  %p35_p0 = scmp.ne.s32.totalorder %s537_s11, %s533_s10 }
   0xa   : > { %p26_p1 = scmp.eq.s32.totalorder %s25_s17, 0  ;;  %p36_p2 = scmp.eq.s32.totalorder %s541_s12, 0 }
   0xb   : > { %p41_p3 = scmp.ne.s32.totalorder %s533_s10, %s529_s9  ;;  %p42_p4 = scmp.eq.s32.totalorder %s582_s13, 0 }
   0xc   : > { %s598_s18 = scalar_select %p26_p1, %s537_s11, %s28_s16  }
   0xd   : > { %p600_p5 = por %p36_p2, %p35_p0  ;;  %p604_p6 = por %p42_p4, %p41_p3 }
   0xe   : > { %p91_p7 = scmp.eq.s32.totalorder %s582_s13, 3  ;;  %p97_p8 = scmp.eq.s32.totalorder %s344_s14, 3 }
   0xf   : > { %s774_s20 = scalar_select %p604_p6, 1, 0 }
  0x10   : > { %p374_p9 = scmp.lt.s32.totalorder %s541_s12, 4  ;;  %p610_p10 = por %p91_p7, %p35_p0 }
  0x11   : > { %p614_p11 = por %p97_p8, %p41_p3  ;;  %s619_s23 = sand.u32 1, %s537_s11  }
  0x12   : > { %s775_s21 = scalar_select %p610_p10, 1, 0 }
  0x13   : > { %s776_s22 = scalar_select %p614_p11, 1, 0 }
  0x14   : > { %s348_s24 = sshll.u32 %s541_s12, 7  ;;  %s347_s25 = sshll.u32 %s619_s23, 3 }
  0x15   : > { %s628_s28 = scalar_lea.hbm %s768_s0, %s348_s24  ;;  %s121_s29 = scalar_lea.vmem [#allocation2], %s347_s25 }
  0x16   : > { %s128_s30 = sshll.u32 %s121_s29, 4  ;;  %p634_p12 = pnand %p374_p9, %p600_p5  ;;  %s638_s30 = int_to_ptr.vmem [resolvable:$true] %s128_s30 }
  0x17   : > { %s118_s4 = scalar_lea.sflag [#allocation3], %s619_s23  ;;  %s410_s5 = scalar_lea.hbm %s628_s28, 128 }
  0x18   : > { %p411_p1 = scmp.ne.s32.totalorder %s628_s28, %s410_s5  ;;  %p412_p2 = pneg %p634_p12 }
  0x19   : > { %s415_s8 = scalar_lea.hbm %s768_s0, 1024  ;;  %p416_p5 = scmp.lt.u32.totalorder %s628_s28, %s768_s0 }
  0x1a   : > { %p413_p3 = pnand %p412_p2, %p411_p1  ;;  %p417_p7 = scmp.lt.u32.totalorder %s415_s8, %s410_s5 }
  0x1b   : > { %p419_p9 = scmp.lt.u32.totalorder %s410_s5, %s628_s28 }
  0x1c   : > { %p414_p4 = pneg %p413_p3  ;;  %p418_p8 = por %p417_p7, %p416_p5 }
  0x1e   : > { %p420_p13 = por %p419_p9, %p418_p8 }
  0x20   : > { %p421_p0 = pnand %p420_p13, %p414_p4 }
  0x22   : > { %424 = shalt.err (!%p421_p0)
}
  0x23   : > { %s425_s17 = scalar_lea.vmem %s638_s30, 128  ;;  %s543_s19 = smov [#allocation2]  }
  0x24   : > { %p426_p1 = scmp.ne.s32.totalorder %s638_s30, %s425_s17  ;;  %s430_s26 = sshll.u32 %s543_s19, 4  ;;  %s431_s26 = int_to_ptr.vmem [resolvable:$false] %s430_s26 }
  0x25   : > { %s432_s27 = scalar_lea.vmem %s431_s26, 256  ;;  %p433_p10 = scmp.lt.s32.totalorder %s638_s30, %s431_s26 }
  0x26   : > { %p428_p3 = pnand %p426_p1, %p412_p2  ;;  %p434_p5 = scmp.lt.s32.totalorder %s432_s27, %s425_s17 }
  0x28   : > { %p429_p11 = pneg %p428_p3  ;;  %p435_p7 = por %p434_p5, %p433_p10 }
  0x2a   : > { %p436_p8 = pnand %p435_p7, %p429_p11 }
  0x2c   : > { %439 = shalt.err (!%p436_p8)
}
  0x2d   : > { %366 = dma.hbm_to_vmem [thread:$0]  (!%p634_p12), %s628_s28, 128, %s638_s30, %s118_s4  }
  0x2e   : > { %p778_p13 = scmp.lt.s32.totalorder %s541_s12, 5  ;;  %p779_p0 = scmp.ge.s32.totalorder %s541_s12, 1 }
  0x2f   : > { %s289_s7 = scalar_lea.hbm %s769_s1, %s348_s24  ;;  %s139_s14 = scalar_lea.vmem [#allocation5], %s347_s25 }
  0x30   : > { %p672_p4 = pnand %p779_p0, %p778_p13  ;;  %s681_s8 = scalar_lea.hbm %s289_s7, 512 }
  0x31   : > { %s147_s16 = sshll.u32 %s139_s14, 4  ;;  %s136_s28 = scalar_lea.sflag [#allocation6], %s619_s23  ;;  %s148_s16 = int_to_ptr.vmem [resolvable:$true] %s147_s16 }
  0x32   : > { %s780_s29 = scalar_select %p672_p4, 1, 0 }
  0x33   : > { %s470_s30 = scalar_lea.hbm %s289_s7, 640  ;;  %s445_s24 = scalar_lea.hbm %s769_s1, 1024 }
  0x34   : > { %p441_p10 = scmp.ne.s32.totalorder %s681_s8, %s470_s30  ;;  %p446_p1 = scmp.lt.u32.totalorder %s681_s8, %s769_s1 }
  0x35   : > { %p447_p3 = scmp.lt.u32.totalorder %s445_s24, %s470_s30  ;;  %p449_p7 = scmp.lt.u32.totalorder %s470_s30, %s681_s8 }
  0x36   : > { %p443_p11 = pnand %p441_p10, %p412_p2 }
  0x37   : > { %p448_p5 = por %p447_p3, %p446_p1 }
  0x38   : > { %p444_p9 = pneg %p443_p11 }
  0x39   : > { %p450_p8 = por %p449_p7, %p448_p5 }
  0x3b   : > { %p451_p13 = pnand %p450_p8, %p444_p9 }
  0x3d   : > { %454 = shalt.err (!%p451_p13)
}
  0x3e   : > { %s455_s23 = scalar_lea.vmem %s148_s16, 128  ;;  %s544_s25 = smov [#allocation5]  }
  0x3f   : > { %p456_p0 = scmp.ne.s32.totalorder %s148_s16, %s455_s23  ;;  %s460_s27 = sshll.u32 %s544_s25, 4  ;;  %s461_s27 = int_to_ptr.vmem [resolvable:$false] %s460_s27 }
  0x40   : > { %s462_s5 = scalar_lea.vmem %s461_s27, 256  ;;  %p463_p6 = scmp.lt.s32.totalorder %s148_s16, %s461_s27 }
  0x41   : > { %p458_p10 = pnand %p456_p0, %p412_p2  ;;  %p464_p4 = scmp.lt.s32.totalorder %s462_s5, %s455_s23 }
  0x43   : > { %p459_p11 = pneg %p458_p10  ;;  %p465_p1 = por %p464_p4, %p463_p6 }
  0x45   : > { %p466_p3 = pnand %p465_p1, %p459_p11 }
  0x47   : > { %469 = shalt.err (!%p466_p3)
}
  0x48   : > { %369 = dma.hbm_to_vmem [thread:$0]  (!%p634_p12), %s681_s8, 128, %s148_s16, %s136_s28  }
  0x49   : > { %p781_p9 = scmp.ne.s32.totalorder %s780_s29, 0 }
  0x4a   : > { %s707_s6 = sand.u32 (!%p781_p9), 1, %s533_s10   ;;  %p782_p2 = scmp.ne.s32.totalorder (!%p781_p9), %s774_s20, 0 }
  0x4b   : > { %156 = sbr.rel (%p781_p9) target bundleno = 149 (0x95), region = 28  ;;  %s352_s7 = sshll.u32 (!%p781_p9), %s707_s6, 3 }
  0x4c   : > { %s159_s14 = scalar_lea.sflag (!%p781_p9), [#allocation3], %s707_s6  ;;  %s162_s30 = scalar_lea.vmem (!%p781_p9), [#allocation2], %s352_s7 }
  0x52   : > { %516 = dma.done.wait (%p782_p2), %s159_s14, 128  }
  0x53   : > { %518 = vsyncadd (%p782_p2), %s159_s14, 4294967168  ;;  %s168_s3 = scalar_lea.sflag [#allocation6], %s707_s6  ;;  %s171_s8 = scalar_lea.vmem [#allocation5], %s352_s7 }
  0x54   : > { %520 = dma.done.wait (%p782_p2), %s168_s3, 128  }
  0x55   : > { %522 = vsyncadd (%p782_p2), %s168_s3, 4294967168  ;;  %v196_v0 = vld [vmem:[%s162_s30] sm:$0xff]  ;;  %v197_v1 = vld [vmem:[%s171_s8] sm:$0xff]  ;;  %s195_s20 = scalar_lea.vmem [#allocation7], %s707_s6  ;;  %s354_s16 = sshll.u32 %s582_s13, 4 }
  0x56   : > { %v198_v2 = vrot.slane %v196_v0, 4  ;;  %v205_v3 = vrot.slane %v197_v1, 4  ;;  %s254_s29 = sshll.u32 %s195_s20, 4  ;;  %s727_s17 = scalar_lea.hbm %s770_s2, %s354_s16  ;;  %s722_s29 = int_to_ptr.vmem [resolvable:$true] %s254_s29 }
  0x57   : > { %s242_s24 = scalar_lea.sflag [#allocation4], %s707_s6  ;;  %s471_s19 = scalar_lea.vmem %s722_s29, 16 }
  0x58   : > { %v199_v4 = vadd.f32 %v198_v2, %v196_v0  ;;  %v206_v5 = vadd.f32 %v205_v3, %v197_v1  ;;  %p472_p6 = scmp.ne.s32.totalorder %s722_s29, %s471_s19  ;;  %p783_p12 = scmp.ne.s32.totalorder %s775_s21, 0 }
  0x59   : > { %s545_s13 = smov [#allocation7]  }
  0x5a   : > { %v200_v6 = vrot.slane %v199_v4, 2  ;;  %v207_v7 = vrot.slane %v206_v5, 2  ;;  %p473_p4 = pnand %p472_p6, %p783_p12  ;;  %s475_s26 = sshll.u32 %s545_s13, 4  ;;  %s476_s26 = int_to_ptr.vmem [resolvable:$false] %s475_s26 }
  0x5b   : > { %s477_s23 = scalar_lea.vmem %s476_s26, 32  ;;  %p478_p7 = scmp.lt.s32.totalorder %s722_s29, %s476_s26 }
  0x5c   : > { %v201_v8 = vadd.f32 %v200_v6, %v199_v4  ;;  %v208_v9 = vadd.f32 %v207_v7, %v206_v5  ;;  %p474_p5 = pneg %p473_p4  ;;  %p479_p8 = scmp.lt.s32.totalorder %s477_s23, %s471_s19 }
  0x5e   : > { %v202_v10 = vrot.slane %v201_v8, 1  ;;  %v209_v11 = vrot.slane %v208_v9, 1  ;;  %p480_p13 = por %p479_p8, %p478_p7 }
  0x60   : > { %v203_v12 = vadd.f32 %v202_v10, %v201_v8  ;;  %v210_v13 = vadd.f32 %v209_v11, %v208_v9  ;;  %p481_p0 = pnand %p480_p13, %p474_p5 }
  0x62   : > { %v204_v14 = vmul.f32 0.125, %v203_v12  ;;  %v211_v15 = vmul.f32 0.125, %v210_v13 }
  0x64   : > { %v212_v16 = vsub.f32 %v196_v0, %v204_v14  ;;  %v213_v17 = vsub.f32 %v197_v1, %v211_v15 }
  0x66   : > { %v214_v18 = vmul.f32 %v212_v16, %v212_v16  ;;  %v221_v19 = vmul.f32 %v213_v17, %v213_v17  ;;  %v228_v20 = vmul.f32 %v213_v17, %v212_v16 }
  0x68   : > { %v215_v21 = vrot.slane %v214_v18, 4  ;;  %v222_v22 = vrot.slane %v221_v19, 4  ;;  %v229_v23 = vrot.slane %v228_v20, 4 }
  0x6a   : > { %v216_v24 = vadd.f32 %v215_v21, %v214_v18  ;;  %v223_v25 = vadd.f32 %v222_v22, %v221_v19  ;;  %v230_v28 = vadd.f32 %v229_v23, %v228_v20 }
  0x6c   : > { %v217_v26 = vrot.slane %v216_v24, 2  ;;  %v224_v27 = vrot.slane %v223_v25, 2  ;;  %v231_v33 = vrot.slane %v230_v28, 2 }
  0x6e   : > { %v218_v29 = vadd.f32 %v217_v26, %v216_v24  ;;  %v225_v30 = vadd.f32 %v224_v27, %v223_v25  ;;  %v232_v37 = vadd.f32 %v231_v33, %v230_v28 }
  0x70   : > { %v219_v31 = vrot.slane %v218_v29, 1  ;;  %v226_v32 = vrot.slane %v225_v30, 1  ;;  %v233_v38 = vrot.slane %v232_v37, 1 }
  0x72   : > { %v220_v34 = vadd.f32 %v219_v31, %v218_v29  ;;  %v227_v35 = vadd.f32 %v226_v32, %v225_v30  ;;  %v234_v39 = vadd.f32 %v233_v38, %v232_v37 }
  0x74   : > { %v235_v36 = vmul.f32 %v227_v35, %v220_v34 }
  0x76   : > { %408 = vrsqrt.f32 %v235_v36 }
  0x80   : > { %v409_v40 = vpop.eup %408 }
  0x81   : > { %v237_v41 = vmul.f32 %v409_v40, %v234_v39 }
  0x83   : > { %v238_v42 = vsub.f32 1.0, %v237_v41 }
  0x85   : > { %v239_v43 = vmul.f32 14.0, %v238_v42 }
  0x87   : > { %240 = vst [vmem:[%s195_s20] sm:$0x1] %v239_v43 }
  0x88   : > { %484 = shalt.err (!%p481_p0)
}
  0x89   : > { %s485_s25 = scalar_lea.hbm %s727_s17, 16  ;;  %s489_s6 = scalar_lea.hbm %s770_s2, 64 }
  0x8a   : > { %p486_p10 = scmp.ne.s32.totalorder %s727_s17, %s485_s25  ;;  %p490_p3 = scmp.lt.u32.totalorder %s727_s17, %s770_s2 }
  0x8b   : > { %p491_p9 = scmp.lt.u32.totalorder %s489_s6, %s485_s25  ;;  %p493_p6 = scmp.lt.u32.totalorder %s485_s25, %s727_s17 }
  0x8c   : > { %p487_p11 = pnand %p486_p10, %p783_p12 }
  0x8d   : > { %p492_p2 = por %p491_p9, %p490_p3 }
  0x8e   : > { %p488_p1 = pneg %p487_p11 }
  0x8f   : > { %p494_p4 = por %p493_p6, %p492_p2 }
  0x91   : > { %p495_p5 = pnand %p494_p4, %p488_p1 }
  0x93   : > { %498 = shalt.err (!%p495_p5)
}
  0x94   : > { %361 = dma.vmem_to_hbm [thread:$0]  (%p783_p12), %s722_s29, 16, %s727_s17, %s242_s24  }
  0x95 PF: > { %p375_p7 = scmp.ge.s32.totalorder %s541_s12, 2  ;;  %s266_s30 = sand.u32 1, %s529_s9  }
  0x96   : > { %p784_p8 = scmp.ne.s32.totalorder %s776_s22, 0  ;;  %s267_s3 = scalar_lea.sflag [#allocation4], %s266_s30 }
  0x98   : > { %p371_p13 = pnand %p375_p7, %p784_p8 }
  0x9a   : > { %524 = dma.done.wait (!%p371_p13), %s267_s3, 16  }
  0x9b   : > { %526 = vsyncadd (!%p371_p13), %s267_s3, 4294967280  ;;  %p18_p0 = scmp.ge.s32.totalorder %s586_s15, 6   ;;  %s785_s9 = smov %s533_s10 }
  0x9c   : > { %s786_s10 = smov %s537_s11  ;;  %s787_s11 = smov %s598_s18 }
  0x9d   : > { %s788_s12 = smov %s586_s15  ;;  %20 = sbr.rel (!%p18_p0) target bundleno = 7 (0x7), region = 86 }
  0xa4   :  { %271 = vsyncpa [#allocation3], 1 }
  0xa5   :  { %273 = vsyncpa [#allocation3 + $0x1], 1 }
  0xa6   :  { %274 = vsyncpa [#allocation6], 1 }
  0xa7   :  { %276 = vsyncpa [#allocation6 + $0x1], 1 }
  0xa8   :  { %277 = vsyncpa [#allocation4], 1 }
  0xa9   :  { %279 = vsyncpa [#allocation4 + $0x1], 1 }

</bundles_post_ra>
